<compile_context>
chip_gen: v7x
topology: tpu7x:2x2x1
jax: 0.10.0
libtpu: 0.0.40
codegen_flags: <defaults>
</compile_context>

<pallas_src>
import functools

import jax
import jax.numpy as jnp
from jax import lax
from jax.experimental import pallas as pl
from jax.experimental.pallas import tpu as pltpu


def _round_up(x, m):
    return (x + m - 1) // m * m


# ---------------------------------------------------------------------------
# Kernel 1: whole graph resident in VMEM (single HBM pass over E).
# ---------------------------------------------------------------------------
def _attention_resident_kernel(emb_ref, w_ref, out_ref, *, inv_n):
    """Grid: (batch,).  emb_ref: (1, N, F); w_ref: (F, F); out_ref: (1, 1, F)."""
    emb = emb_ref[0].astype(jnp.float32)                            # (N, F)
    # mean-before-matmul (exact by linearity): (1,F) @ (F,F) on the MXU.
    mean = jnp.sum(emb, axis=0, keepdims=True) * inv_n
    ctx = jnp.dot(mean, w_ref[...], preferred_element_type=jnp.float32)
    tg = jnp.tanh(ctx)                                              # (1, F)
    scores = jax.nn.sigmoid(
        lax.dot_general(emb, tg,
                        dimension_numbers=(((1,), (1,)), ((), ())),
                        preferred_element_type=jnp.float32))        # (N, 1)
    rep = lax.dot_general(scores, emb,
                          dimension_numbers=(((0,), (0,)), ((), ())),
                          preferred_element_type=jnp.float32)       # (1, F)
    out_ref[...] = rep[None]


# ---------------------------------------------------------------------------
# Kernel 2: two-phase streaming fallback for graphs too large for VMEM.
# ---------------------------------------------------------------------------
def _attention_streaming_kernel(emb_ref, w_ref, out_ref, colsum_ref, tg_ref, *,
                                inv_n, num_nodes, mask_rows):
    """Grid: (batch, phase, node_tile).

    emb_ref: (1, TN, F) node tile; w_ref: (F, F); out_ref: (1, 1, F) resident
    accumulator; colsum_ref / tg_ref: (1, F) f32 VMEM scratch.
    """
    phase = pl.program_id(1)
    tile = pl.program_id(2)

    emb = emb_ref[0].astype(jnp.float32)                            # (TN, F)
    if mask_rows:
        # Last node tile may run past N (no host-side pad copy): zero the
        # out-of-range rows so they contribute exactly nothing.
        row = tile * emb.shape[0] + lax.broadcasted_iota(jnp.int32, emb.shape, 0)
        emb = jnp.where(row < num_nodes, emb, 0.0)

    # ---------------- phase 0: accumulate column-sum of E ----------------
    @pl.when(phase == 0)
    def _phase0():
        @pl.when(tile == 0)
        def _():
            colsum_ref[...] = jnp.zeros_like(colsum_ref)
        colsum_ref[...] += jnp.sum(emb, axis=0, keepdims=True)

    # ---------- phase 1: attention scores + weighted node sum ------------
    @pl.when(phase == 1)
    def _phase1():
        @pl.when(tile == 0)
        def _():
            mean = colsum_ref[...] * inv_n
            ctx = jnp.dot(mean, w_ref[...], preferred_element_type=jnp.float32)
            tg_ref[...] = jnp.tanh(ctx)
            out_ref[...] = jnp.zeros_like(out_ref)
        scores = jax.nn.sigmoid(
            lax.dot_general(emb, tg_ref[...],
                            dimension_numbers=(((1,), (1,)), ((), ())),
                            preferred_element_type=jnp.float32))    # (TN, 1)
        partial = lax.dot_general(scores, emb,
                                  dimension_numbers=(((0,), (0,)), ((), ())),
                                  preferred_element_type=jnp.float32)  # (1, F)
        out_ref[...] += partial[None]


# Cap the double-buffered embedding stream so the kernel fits comfortably in
# v7x's 64 MiB VMEM (v5e/v6e have 128 MiB, so this is conservative there).
_EMB_DOUBLE_BUFFER_BUDGET = 16 * 1024 * 1024


def attention_module_forward_batched(embeddings, weight_matrix, *,
                                     node_tile=None, stream_dtype=None):
    """embeddings: (B, N, F), weight_matrix: (F, F) -> (B, F, 1) float32.

    All graphs in the batch share the same node count N (matching the PyTorch
    module, which is single-graph).
    # TODO(synk): ragged batches need per-graph node counts via scalar prefetch.
    """
    b, n, f = embeddings.shape
    assert weight_matrix.shape == (f, f)

    stream_dtype = jnp.dtype(stream_dtype or embeddings.dtype)
    emb = embeddings.astype(stream_dtype)          # no-op when dtypes match
    w = weight_matrix.astype(jnp.float32)

    lane_f = _round_up(f, 128)                     # VMEM lane padding (internal only)
    itemsize = stream_dtype.itemsize
    w_buf_bytes = 2 * f * lane_f * 4

    # Largest node tile whose double buffer stays inside the budget.
    max_tn = max(8, (_EMB_DOUBLE_BUFFER_BUDGET // (2 * lane_f * itemsize)) // 8 * 8)
    if node_tile is not None:
        max_tn = min(max_tn, _round_up(max(int(node_tile), 8), 8))

    if n <= max_tn:
        # ---- fast path: whole graph resident, E read from HBM exactly once ----
        emb_buf_bytes = 2 * _round_up(n, 8) * lane_f * itemsize
        vmem_limit = min(48 * 1024 * 1024,
                         max(16 * 1024 * 1024, 2 * (emb_buf_bytes + w_buf_bytes)))
        cost = pl.CostEstimate(
            flops=int(b * (6 * n * f + 2 * f * f)),
            transcendentals=int(b * (n + f)),
            bytes_accessed=int(b * n * f * itemsize + f * f * 4 + b * f * 4),
        )
        out = pl.pallas_call(
            functools.partial(_attention_resident_kernel, inv_n=1.0 / n),
            out_shape=jax.ShapeDtypeStruct((b, 1, f), jnp.float32),
            grid_spec=pltpu.PrefetchScalarGridSpec(
                num_scalar_prefetch=0,
                grid=(b,),
                in_specs=[
                    pl.BlockSpec((1, n, f), lambda bi: (bi, 0, 0)),
                    pl.BlockSpec((f, f), lambda bi: (0, 0)),
                ],
                out_specs=pl.BlockSpec((1, 1, f), lambda bi: (bi, 0, 0)),
            ),
            compiler_params=pltpu.CompilerParams(
                dimension_semantics=("parallel",),
                vmem_limit_bytes=int(vmem_limit),
            ),
            cost_estimate=cost,
        )(emb, w)
    else:
        # ---- fallback: two-phase streaming over large node tiles ----
        tn = max_tn
        n_tiles = (n + tn - 1) // tn
        mask_rows = (n % tn) != 0
        emb_buf_bytes = 2 * tn * lane_f * itemsize
        vmem_limit = min(48 * 1024 * 1024,
                         max(16 * 1024 * 1024, 2 * (emb_buf_bytes + w_buf_bytes)))
        cost = pl.CostEstimate(
            flops=int(b * (6 * n * f + 2 * f * f)),
            transcendentals=int(b * (n + f)),
            bytes_accessed=int(2 * b * n * f * itemsize + f * f * 4 + b * f * 4),
        )
        kernel = functools.partial(_attention_streaming_kernel,
                                   inv_n=1.0 / n, num_nodes=n,
                                   mask_rows=mask_rows)
        out = pl.pallas_call(
            kernel,
            out_shape=jax.ShapeDtypeStruct((b, 1, f), jnp.float32),
            grid_spec=pltpu.PrefetchScalarGridSpec(
                num_scalar_prefetch=0,
                grid=(b, 2, n_tiles),
                in_specs=[
                    pl.BlockSpec((1, tn, f), lambda bi, p, t: (bi, t, 0)),
                    pl.BlockSpec((f, f), lambda bi, p, t: (0, 0)),
                ],
                out_specs=pl.BlockSpec((1, 1, f), lambda bi, p, t: (bi, 0, 0)),
                scratch_shapes=[
                    pltpu.VMEM((1, f), jnp.float32),   # running column sum of E
                    pltpu.VMEM((1, f), jnp.float32),   # tanh(mean @ W)
                ],
            ),
            compiler_params=pltpu.CompilerParams(
                # TODO(synk): on v7x with B == 1, split the node-tile axis across
                # the two TensorCores (core_map) instead of relying on batch.
                dimension_semantics=("parallel", "arbitrary", "arbitrary"),
                vmem_limit_bytes=int(vmem_limit),
            ),
            cost_estimate=cost,
        )(emb, w)

    # (B, 1, F) and (B, F, 1) share the same row-major layout: free reshape,
    # no transpose / slice epilogue.
    return out.reshape(b, f, 1)


def attention_module_forward(embedding, weight_matrix, **kwargs):
    """Single-graph API matching the PyTorch module: (N, F) -> (F, 1)."""
    return attention_module_forward_batched(embedding[None], weight_matrix,
                                            **kwargs)[0]


def reference_forward(embedding, weight_matrix):
    gc = jnp.mean(embedding @ weight_matrix, axis=0)
    tg = jnp.tanh(gc)
    scores = jax.nn.sigmoid(embedding @ tg.reshape(-1, 1))
    return embedding.T @ scores


if __name__ == "__main__":
    key = jax.random.PRNGKey(0)
    k_emb, k_w = jax.random.split(key)

    batch = 2        # graphs per kernel launch
    num_nodes = 20   # N (deliberately not a multiple of 8)
    filters_3 = 32   # F = args.filters_3

    embeddings = jax.random.normal(
        k_emb, (batch, num_nodes, filters_3), dtype=jnp.float32)

    # Xavier / Glorot uniform init for the (F, F) weight matrix.
    bound = (6.0 / (filters_3 + filters_3)) ** 0.5
    weight_matrix = jax.random.uniform(
        k_w, (filters_3, filters_3), dtype=jnp.float32, minval=-bound, maxval=bound)

    refs = jnp.stack([reference_forward(embeddings[g], weight_matrix)
                      for g in range(batch)])

    # 1) Fast path: whole graph resident in VMEM, E read from HBM once.
    reps = jax.block_until_ready(
        attention_module_forward_batched(embeddings, weight_matrix))
    assert reps.shape == (batch, filters_3, 1), reps.shape
    assert jnp.allclose(reps, refs, atol=1e-5, rtol=1e-5), "mismatch (resident)"

    # 2) Streaming fallback (tiny tile only to exercise multi-tile accumulation
    #    and the last-tile row mask; production tiles are thousands of rows).
    reps_s = jax.block_until_ready(
        attention_module_forward_batched(embeddings, weight_matrix, node_tile=8))
    assert jnp.allclose(reps_s, refs, atol=1e-5, rtol=1e-5), "mismatch (streaming)"

    # 3) bf16 streaming of E (halves HBM traffic); accumulation stays f32.
    reps_bf16 = jax.block_until_ready(
        attention_module_forward_batched(embeddings, weight_matrix,
                                         stream_dtype=jnp.bfloat16))
    assert jnp.allclose(reps_bf16, refs, atol=1e-1, rtol=1e-1), "mismatch (bf16)"

    # Single-graph path matches the PyTorch module's (F, 1) output shape.
    rep0 = jax.block_until_ready(
        attention_module_forward(embeddings[0], weight_matrix))
    assert rep0.shape == (filters_3, 1), rep0.shape
    assert jnp.allclose(rep0, refs[0], atol=1e-5, rtol=1e-5), "mismatch single-graph"

    print("KERNEL_OK")
</pallas_src>

<mosaic_0001>
module attributes {stable_mosaic.version = 11 : i64} {
  func.func @_attention_resident_kernel(%arg0: i32, %arg1: memref<1x20x32xf32, #tpu.memory_space<vmem>>, %arg2: memref<32x32xf32, #tpu.memory_space<vmem>>, %arg3: memref<1x1x32xf32, #tpu.memory_space<vmem>>) attributes {dimension_semantics = [#tpu.dimension_semantics<parallel>], iteration_bounds = array<i64: 2>, scalar_prefetch = 0 : i64, scratch_operands = 0 : i64, tpu.core_type = #tpu.core_type<tc>, window_params = [{transform_indices = @transform_0, window_bounds = array<i64: 1, 20, 32>}, {pipeline_mode = #tpu.pipeline_mode<synchronous>, transform_indices = @transform_1, window_bounds = array<i64: 32, 32>}, {transform_indices = @transform_2, window_bounds = array<i64: 1, 1, 32>}]} {
    %c0 = arith.constant 0 : index
    %c0_0 = arith.constant 0 : index
    %c0_1 = arith.constant 0 : index
    %0 = vector.load %arg1[%c0, %c0_0, %c0_1] : memref<1x20x32xf32, #tpu.memory_space<vmem>>, vector<1x20x32xf32>
    %1 = vector.shape_cast %0 : vector<1x20x32xf32> to vector<20x32xf32>
    %cst = arith.constant dense<0.000000e+00> : vector<32xf32>
    %2 = vector.multi_reduction <add>, %1, %cst [0] : vector<20x32xf32> to vector<32xf32>
    %3 = vector.shape_cast %2 : vector<32xf32> to vector<1x32xf32>
    %cst_2 = arith.constant 5.000000e-02 : f32
    %4 = vector.broadcast %cst_2 : f32 to vector<1x32xf32>
    %5 = arith.mulf %3, %4 : vector<1x32xf32>
    %c0_3 = arith.constant 0 : index
    %c0_4 = arith.constant 0 : index
    %6 = vector.load %arg2[%c0_3, %c0_4] : memref<32x32xf32, #tpu.memory_space<vmem>>, vector<32x32xf32>
    %cst_5 = arith.constant dense<0.000000e+00> : vector<1x32xf32>
    %7 = tpu.matmul %5, %6, %cst_5 {dimension_numbers = #tpu.dot_dimension_numbers<[1], [0], [0], [1], [0, 0, 1, 1], [], []>} : vector<1x32xf32>, vector<32x32xf32>, vector<1x32xf32> -> vector<1x32xf32>
    %8 = math.tanh %7 : vector<1x32xf32>
    %cst_6 = arith.constant dense<0.000000e+00> : vector<20x1xf32>
    %9 = tpu.matmul %1, %8, %cst_6 {dimension_numbers = #tpu.dot_dimension_numbers<[1], [1], [0], [0], [0, 0, 1, 0], [], []>} : vector<20x32xf32>, vector<1x32xf32>, vector<20x1xf32> -> vector<20x1xf32>
    %10 = arith.negf %9 : vector<20x1xf32>
    %11 = math.exp %10 : vector<20x1xf32>
    %cst_7 = arith.constant 1.000000e+00 : f32
    %12 = vector.broadcast %cst_7 : f32 to vector<20x1xf32>
    %13 = arith.addf %12, %11 : vector<20x1xf32>
    %14 = arith.divf %12, %13 : vector<20x1xf32>
    %cst_8 = arith.constant dense<0.000000e+00> : vector<1x32xf32>
    %15 = tpu.matmul %14, %1, %cst_8 {dimension_numbers = #tpu.dot_dimension_numbers<[0], [0], [1], [1], [0, 1, 1, 1], [], []>} : vector<20x1xf32>, vector<20x32xf32>, vector<1x32xf32> -> vector<1x32xf32>
    %16 = vector.shape_cast %15 : vector<1x32xf32> to vector<1x1x32xf32>
    %c0_9 = arith.constant 0 : index
    %c0_10 = arith.constant 0 : index
    %c0_11 = arith.constant 0 : index
    %17 = vector.load %arg3[%c0_9, %c0_10, %c0_11] : memref<1x1x32xf32, #tpu.memory_space<vmem>>, vector<1x1x32xf32>
    tpu.vector_store %arg3[%c0_9, %c0_10, %c0_11], %16 {strides = array<i32>} : memref<1x1x32xf32, #tpu.memory_space<vmem>>, vector<1x1x32xf32>,
    return
  }
  func.func @transform_0(%arg0: i32) -> (i32, i32, i32) {
    %c0_i32 = arith.constant 0 : i32
    %c0_i32_0 = arith.constant 0 : i32
    %c0_i32_1 = arith.constant 0 : i32
    return %arg0, %c0_i32, %c0_i32_0 : i32, i32, i32
  }
  func.func @transform_1(%arg0: i32) -> (i32, i32) {
    %c0_i32 = arith.constant 0 : i32
    %c0_i32_0 = arith.constant 0 : i32
    %c0_i32_1 = arith.constant 0 : i32
    return %c0_i32, %c0_i32_0 : i32, i32
  }
  func.func @transform_2(%arg0: i32) -> (i32, i32, i32) {
    %c0_i32 = arith.constant 0 : i32
    %c0_i32_0 = arith.constant 0 : i32
    %c0_i32_1 = arith.constant 0 : i32
    return %arg0, %c0_i32, %c0_i32_0 : i32, i32, i32
  }
}

</mosaic_0001>

<bundles_post_ra>
// kernel: tpu_custom_call.1
= control target key start
LH: loop header
LB: loop body
LE: loop exit
PB: predicated region body
PF: predicated region fallthrough
CT: control target
= control target key end

     0   :  { %7 = vsyncpa [#allocation3], 0  ;;  %s761_s0 = inlined_call_operand.vmem [shape: f32[2,20,32], index: 0, kind: input, shape index: {}]   ;;  %s762_s1 = inlined_call_operand.vmem [shape: f32[32,32], index: 1, kind: input, shape index: {}]   ;;  %s763_s2 = inlined_call_operand.hbm [shape: f32[2,1,32], index: 2, kind: output, shape index: {}]  }
   0x1   :  { %9 = vsyncpa [#allocation3 + $0x1], 0  ;;  %s642_s9 = smov 0   ;;  %s644_s10 = smov 0  }
   0x2   :  { %s646_s11 = smov 0   ;;  %s648_s12 = smov 0  }
   0x3 LB: > { %s663_s13 = sadd.s32 4294967295, %s621_s12   ;;  %s450_s14 = sadd.s32 4294967294, %s621_s12   ;;  %s621_s12 = sphi %s648_s12, %s769_s12   ;;  %s617_s11 = sphi %s646_s11, %s768_s11   ;;  %s613_s10 = sphi %s644_s10, %s767_s10   ;;  %s609_s9 = sphi %s642_s9, %s766_s9  }
   0x4   : > { %s667_s15 = sadd.s32 1, %s621_s12   ;;  %s69_s16 = sadd.s32 1, %s617_s11 }
   0x5   : > { %s66_s17 = ssub.s32 %s621_s12, %s667_s15  ;;  %p79_p0 = scmp.ne.s32.totalorder %s617_s11, %s613_s10 }
   0x6   : > { %p67_p1 = scmp.eq.s32.totalorder %s66_s17, 0  ;;  %p80_p2 = scmp.eq.s32.totalorder %s663_s13, 1 }
   0x7   : > { %p85_p3 = scmp.ne.s32.totalorder %s613_s10, %s609_s9  ;;  %p86_p4 = scmp.eq.s32.totalorder %s450_s14, 1 }
   0x8   : > { %s678_s18 = scalar_select %p67_p1, %s617_s11, %s69_s16  }
   0x9   : > { %p680_p5 = por %p80_p2, %p79_p0  ;;  %p684_p6 = por %p86_p4, %p85_p3 }
   0xa   : > { %p453_p7 = scmp.ge.s32.totalorder %s621_s12, 1  ;;  %p115_p8 = scmp.lt.s32.totalorder %s621_s12, 3 }
   0xc   : > { %p116_p9 = pnand %p453_p7, %p115_p8 }
   0xd   : > { %v158_v0 = vld [vmem:[%s762_s1] sm:$0xff] (!%p116_p9)  ;;  %v159_v1 = vld [vmem:[%s762_s1 + $0x8] sm:$0xff] (!%p116_p9)  ;;  %v160_v2 = vld [vmem:[%s762_s1 + $0x10] sm:$0xff] (!%p116_p9)  ;;  %v623_v3 = vmov (!%p116_p9), 0.0|0.0   ;;  %vm624_vm0 = vmmov (!%p116_p9), 0   ;;  %v625_v6 = vmov (!%p116_p9), 0.0   ;;  %v236_v24 = vlaneseq (!%p116_p9) }
   0xe   : > { %119 = sbr.rel (%p116_p9) target bundleno = 797 (0x31d), region = 28  ;;  %493 = vmatprep.subr.bf16.mxu0 (!%p116_p9), %v623_v3  ;;  %v494_v4 = vpack.c.bf16 (!%p116_p9), %v159_v1, %v158_v0  ;;  %v161_v5 = vld [vmem:[%s762_s1 + $0x18] sm:$0xff] (!%p116_p9)  ;;  %481 = vmatprep.mubr.msk.f32.mxu0 (!%p116_p9), %vm624_vm0, %v625_v6  ;;  %p136_p10 = scmp.lt.s32.totalorder (!%p116_p9), %s663_s13, 1  ;;  %vm144_vm1 = vcmask (!%p116_p9), 261120   ;;  %vm148_vm2 = vcmask (!%p116_p9), 257024   ;;  %vm306_vm3 = vcmask (!%p116_p9), 1043456  }
   0xf   : > { %499 = vmatprep.subr.bf16.mxu1 (!%p116_p9), %v623_v3  ;;  %490 = vmatprep.mubr.msk.f32.mxu1 (!%p116_p9), %vm624_vm0, %v625_v6  ;;  %v497_v7 = vpack.c.bf16 (!%p116_p9), %v161_v5, %v160_v2  ;;  %v237_v26 = vshrl.u32 (!%p116_p9), %v236_v24, 7  ;;  %vm302_vm4 = vcmask (!%p116_p9), 162816   ;;  %s134_s6 = sand.u32 (!%p116_p9), 1, %s613_s10   ;;  %s461_s7 = sshll.u32 (!%p116_p9), %s663_s13, 4  ;;  %vm380_vm5 = vcmask (!%p116_p9), 253952  }
  0x10   : > { %495 = vmatpush3.bf16.msra.mxu0 (!%p116_p9), %v494_v4  ;;  %s135_s8 = scalar_lea.vmem (!%p116_p9), [#allocation2], %s134_s6  ;;  %s719_s21 = scalar_lea.hbm (!%p116_p9), %s763_s2, %s461_s7 }
  0x11   : > { %496 = vmatprep.subr.bf16.mxu0 (!%p116_p9), %v623_v3  ;;  %v238_v27 = vsub.s32 (!%p116_p9), 0, %v237_v26  ;;  %s395_s14 = sshll.u32 (!%p116_p9), %s135_s8, 4  ;;  %s383_s22 = scalar_lea.sflag (!%p116_p9), [#allocation3], %s134_s6  ;;  %s721_s14 = int_to_ptr.vmem [resolvable:$true] %s395_s14 }
  0x12   : > { %s559_s23 = scalar_lea.vmem (!%p116_p9), %s721_s14, 16 }
  0x13   : > { %p560_p11 = scmp.ne.s32.totalorder (!%p116_p9), %s721_s14, %s559_s23 }
  0x14   : > { %498 = vmatpush3.bf16.msra.mxu0 (!%p116_p9), %v497_v7 }
  0x15   : > { %s137_s29 = scalar_select %p136_p10, %s663_s13, 1 }
  0x16   : > { %p561_p12 = pnand %p560_p11, %p680_p5  ;;  %s626_s13 = smov [#allocation2]  }
  0x17   : > { %s502_s30 = smul.u32 24, %s137_s29  ;;  %s563_s24 = sshll.u32 %s626_s13, 4  ;;  %s564_s24 = int_to_ptr.vmem [resolvable:$false] %s563_s24 }
  0x18   : > { %p562_p13 = pneg %p561_p12  ;;  %s565_s25 = scalar_lea.vmem %s564_s24, 32 }
  0x19   : > { %s140_s5 = scalar_lea.vmem %s761_s0, %s502_s30  ;;  %p566_p0 = scmp.lt.s32.totalorder %s721_s14, %s564_s24 }
  0x1a   : > { %v141_v8 = vld [vmem:[%s140_s5] sm:$0xff]  ;;  %v142_v9 = vld [vmem:[%s140_s5 + $0x8] sm:$0xff]  ;;  %v143_v10 = vld [vmem:[%s140_s5 + $0x10] sm:$0xf]  ;;  %p567_p1 = scmp.lt.s32.totalorder %s565_s25, %s559_s23 }
  0x1b   : > { %v145_v11 = vsel %vm144_vm1, %v141_v8, 0.0  ;;  %v146_v12 = vsel %vm144_vm1, %v142_v9, 0.0  ;;  %v149_v13 = vsel %vm148_vm2, %v143_v10, 0.0  ;;  %v500_v36 = vpack.c.bf16 %v142_v9, %v141_v8 }
  0x1c   : > { %v147_v14 = vadd.f32 %v146_v12, %v145_v11  ;;  %p568_p2 = por %p567_p1, %p566_p0 }
  0x1d   : > { %501 = vmatpush3.bf16.msra.mxu1 %v500_v36 }
  0x1e   : > { %v150_v15 = vadd.f32 %v149_v13, %v147_v14  ;;  %488 = vmatprep.subr.mxu1 %v625_v6  ;;  %p569_p3 = pnand %p568_p2, %p562_p13 }
  0x20   : > { %v151_v16 = vrot.slane %v150_v15, 4 }
  0x21   : > { %489 = vmatpush3.msk.msra.mxu1 %vm306_vm3, %v143_v10 }
  0x22   : > { %v152_v17 = vadd.f32 %v151_v16, %v150_v15 }
  0x24   : > { %v153_v18 = vrot.slane %v152_v17, 2 }
  0x26   : > { %v154_v19 = vadd.f32 %v153_v18, %v152_v17 }
  0x28   : > { %v155_v20 = vrot.slane %v154_v19, 1 }
  0x2a   : > { %v156_v21 = vadd.f32 %v155_v20, %v154_v19 }
  0x2c   : > { %v157_v22 = vmul.f32 0.05, %v156_v21 }
  0x2e   : > { %482 = vmatmul.mubr.msk.f32.vlgmr.msra.gmra.mrb[0].mxu0 %vm144_vm1, %v157_v22 }
 0x101   : > { %v231_v23 = vpop.f32.mrb[0].mxu0 }
 0x102   : > { %545 = vtanh.f32 %v231_v23  ;;  %v483_v25 = vpop.f32.mrb[1].mxu0 }
 0x10c   : > { %v546_v28 = vpop.eup %545 }
 0x10d   : > { %v239_v29 = vrot.slane %v546_v28, %v238_v27 }
 0x10f   : > { %v242_v30 = vmul.f32 %v239_v29, %v143_v10  ;;  %v240_v31 = vmul.f32 %v239_v29, %v141_v8  ;;  %v241_v34 = vmul.f32 %v239_v29, %v142_v9 }
 0x111   : > { %v249_v32 = vsel %vm148_vm2, %v242_v30, 0.0  ;;  %v243_v33 = vsel %vm144_vm1, %v240_v31, 0.0  ;;  %v246_v35 = vsel %vm144_vm1, %v241_v34, 0.0 }
 0x112   : > { %250 = vadd.xlane.f32.xlu1 %v249_v32  ;;  %244 = vadd.xlane.f32.xlu0 %v243_v33 }
 0x116   : > { %247 = vadd.xlane.f32.xlu0 %v246_v35 }
 0x19f   : > { %v245_v37 = vpop.xlane.xlu0 %244  ;;  %v251_v38 = vpop.xlane.xlu1 %250 }
 0x1a0   : > { %v456_v39 = vmul.f32 -1.442695, %v245_v37  ;;  %v458_v40 = vmul.f32 -1.442695, %v251_v38 }
 0x1a2   : > { %547 = vpow2.f32 %v456_v39 }
 0x1a3   : > { %v248_v41 = vpop.xlane.xlu0 %247 }
 0x1a4   : > { %v457_v42 = vmul.f32 -1.442695, %v248_v41 }
 0x1a6   : > { %549 = vpow2.f32 %v457_v42 }
 0x1a7   : > { %551 = vpow2.f32 %v458_v40 }
 0x1ac   : > { %v548_v43 = vpop.eup %547 }
 0x1ad   : > { %v261_v44 = vadd.f32 1.0, %v548_v43 }
 0x1af   : > { %553 = vrcp.f32 %v261_v44 }
 0x1b0   : > { %v550_v45 = vpop.eup %549 }
 0x1b1   : > { %v552_v46 = vpop.eup %551  ;;  %v262_v47 = vadd.f32 1.0, %v550_v45 }
 0x1b2   : > { %v263_v48 = vadd.f32 1.0, %v552_v46 }
 0x1b3   : > { %555 = vrcp.f32 %v262_v47 }
 0x1b4   : > { %557 = vrcp.f32 %v263_v48 }
 0x1b9   : > { %v554_v49 = vpop.eup %553 }
 0x1ba   : > { %270 = vxpose.xlu1.b32.start [1/3] (short) (narrow) %v554_v49, 8 }
 0x1bd   : > { %v556_v50 = vpop.eup %555 }
 0x1be   : > { %271 = vxpose.xlu1.b32.cont [2/3] (short) (narrow) %v556_v50, 8  ;;  %v558_v51 = vpop.eup %557 }
 0x1c2   : > { %272 = vxpose.xlu1.b32.end [3/3] (short) (narrow) %v558_v51, 8 }
 0x23a   : > { %v286_v52 = vpop.trf.xlu1 }
 0x23b   : > { %491 = vmatmul.mubr.msk.f32.vlgmr.msra.gmra.mrb[0].mxu1 %vm302_vm4, %v286_v52 }
 0x30e   : > { %v376_v53 = vpop.f32.mrb[0].mxu1 }
 0x30f   : > { %381 = vst.msk [vmem:[%s135_s8] sm:$0x1] %vm380_vm5, %v376_v53  ;;  %v492_v54 = vpop.f32.mrb[1].mxu1 }
 0x310   : > { %572 = shalt.err (!%p569_p3)
}
 0x311   : > { %s573_s26 = scalar_lea.hbm %s719_s21, 16  ;;  %s577_s29 = scalar_lea.hbm %s763_s2, 32 }
 0x312   : > { %p574_p4 = scmp.ne.s32.totalorder %s719_s21, %s573_s26  ;;  %p578_p9 = scmp.lt.u32.totalorder %s719_s21, %s763_s2 }
 0x313   : > { %p579_p10 = scmp.lt.u32.totalorder %s577_s29, %s573_s26  ;;  %p581_p12 = scmp.lt.u32.totalorder %s573_s26, %s719_s21 }
 0x314   : > { %p575_p7 = pnand %p574_p4, %p680_p5 }
 0x315   : > { %p580_p11 = por %p579_p10, %p578_p9 }
 0x316   : > { %p576_p8 = pneg %p575_p7 }
 0x317   : > { %p582_p13 = por %p581_p12, %p580_p11 }
 0x319   : > { %p583_p0 = pnand %p582_p13, %p576_p8 }
 0x31b   : > { %586 = shalt.err (!%p583_p0)
}
 0x31c   : > { %503 = dma.vmem_to_hbm [thread:$0]  (%p680_p5), %s721_s14, 16, %s719_s21, %s383_s22  }
 0x31d PF: > { %p509_p1 = scmp.ge.s32.totalorder %s621_s12, 2  ;;  %s407_s4 = sand.u32 1, %s609_s9  }
 0x31e   : > { %s408_s5 = scalar_lea.sflag [#allocation3], %s407_s4 }
 0x31f   : > { %p506_p2 = pnand %p509_p1, %p684_p6 }
 0x321   : > { %604 = dma.done.wait (!%p506_p2), %s408_s5, 16  }
 0x322   : > { %606 = vsyncadd (!%p506_p2), %s408_s5, 4294967280  ;;  %p12_p3 = scmp.ge.s32.totalorder %s667_s15, 4   ;;  %s766_s9 = smov %s613_s10 }
 0x323   : > { %s767_s10 = smov %s617_s11  ;;  %s768_s11 = smov %s678_s18 }
 0x324   : > { %s769_s12 = smov %s667_s15  ;;  %14 = sbr.rel (!%p12_p3) target bundleno = 3 (0x3), region = 63 }
 0x32b   :  { %412 = vsyncpa [#allocation3], 1 }
 0x32c   :  { %414 = vsyncpa [#allocation3 + $0x1], 1 }

</bundles_post_ra>
